<compile_context>
chip_gen: v6e
topology: v6e:2x2x1
jax: 0.10.0
libtpu: 0.0.40
codegen_flags: <defaults>
</compile_context>

<pallas_src>
import jax
import jax.numpy as jnp
from jax.experimental import pallas as pl
from jax.experimental.pallas import tpu as pltpu


def _round_up(n, m):
    return ((n + m - 1) // m) * m


_MIN_TILE_B = 8      # f32 sublane multiple
_MAX_TILE_B = 1024   # measured ~85% of HBM roofline for mem-bound tiles


def _pick_batch_tiling(batch):
    """Balanced batch tiling: big tiles, no near-empty trailing tile, and
    >= 2 grid steps (v7x 2-TC sharding) whenever the batch allows it."""
    if batch <= 2 * _MIN_TILE_B:
        n_tiles = 1
    else:
        n_tiles = max(2, -(-batch // _MAX_TILE_B))
    tile_b = _round_up(-(-batch // n_tiles), _MIN_TILE_B)
    return tile_b, n_tiles, tile_b * n_tiles


def _affine_kernel(x_ref, w_ref, b_ref, o_ref):
    # One MXU matmul (f32 accumulation) + f32 bias add on the VPU.
    o_ref[...] = (
        jnp.dot(x_ref[...], w_ref[...], preferred_element_type=jnp.float32)
        + b_ref[...]
    ).astype(o_ref.dtype)


def _collapse_affine_chain(params):
    """Fold the 5 (identity-activation) affine layers into one (W, b)."""
    w_tot, b_tot = params[0]
    for w, b in params[1:]:
        b_tot = b_tot @ w + b
        w_tot = w_tot @ w
    return w_tot, b_tot


@jax.jit
def discriminator_forward(x, params):
    """Fused Discriminator forward pass.

    x:      [B, D] float32
    params: list of (W, b) with W: [in, out] (transpose of PyTorch's [out, in]),
            b: [1, out]
    """
    B, D = x.shape
    out_dim = params[-1][0].shape[1]

    # ---- collapse the affine chain (cheap, amortized under jit) -------------
    w_tot, b_tot = _collapse_affine_chain(params)          # [D, out], [1, out]

    # ---- output lane padding -------------------------------------------------
    # Lane-dense 128-wide slab only when the batch is small (store-slot regime);
    # at large B the padded writeback would dominate HBM traffic, so keep the
    # exact out_dim (masked stores are cheaper than 32x write bytes there).
    lane_dense = (out_dim % 128 != 0) and (B <= 1024)
    out_pad = _round_up(out_dim, 128) if lane_dense else out_dim
    if out_pad != out_dim:
        w_tot = jnp.pad(w_tot, ((0, 0), (0, out_pad - out_dim)))
        b_tot = jnp.pad(b_tot, ((0, 0), (0, out_pad - out_dim)))

    # ---- batch tiling ----------------------------------------------------------
    tile_b, n_tiles, padded_b = _pick_batch_tiling(B)
    if padded_b != B:
        x = jnp.pad(x, ((0, padded_b - B), (0, 0)))

    # ---- MXU operand dtype ----------------------------------------------------
    # bf16 operands (f32 accumulation) only pay off at non-toy widths; keep the
    # bias add in f32 everywhere (v5e VPU/EUP have no bf16 path).
    if D >= 256:
        x = x.astype(jnp.bfloat16)
        w_tot = w_tot.astype(jnp.bfloat16)

    # ---- VMEM budget (v5e scoped default is only 16 MiB) -----------------------
    vmem_bytes = 4 * (2 * tile_b * D            # double-buffered x tiles
                      + D * out_pad + out_pad   # resident W_total / b_total
                      + 2 * tile_b * out_pad)   # double-buffered out tiles
    vmem_limit = int(min(max(2 * vmem_bytes, 32 << 20), 64 << 20))

    flops = 2 * padded_b * D * out_pad
    bytes_accessed = 4 * (padded_b * D + D * out_pad + out_pad
                          + padded_b * out_pad)

    out = pl.pallas_call(
        _affine_kernel,
        out_shape=jax.ShapeDtypeStruct((padded_b, out_pad), jnp.float32),
        grid_spec=pl.GridSpec(
            grid=(n_tiles,),
            in_specs=[
                # x: tiled over the batch grid.
                pl.BlockSpec((tile_b, D), lambda i: (i, 0)),
                # W_total / b_total: constant index_map -> stay resident in
                # VMEM across grid steps (no re-DMA).
                pl.BlockSpec((D, out_pad), lambda i: (0, 0)),
                pl.BlockSpec((1, out_pad), lambda i: (0, 0)),
            ],
            out_specs=pl.BlockSpec((tile_b, out_pad), lambda i: (i, 0)),
        ),
        compiler_params=pltpu.CompilerParams(
            dimension_semantics=("parallel",),
            vmem_limit_bytes=vmem_limit,
        ),
        cost_estimate=pl.CostEstimate(
            flops=flops, transcendentals=0, bytes_accessed=bytes_accessed),
    )(x, w_tot, b_tot)

    return out[:B, :out_dim]


def init_discriminator_params(key, input_dim, output_dim):
    """Deterministic init matching the PyTorch layer shapes (W stored [in, out])."""
    dims = [
        (input_dim, input_dim * 2),
        (input_dim * 2, input_dim * 2),
        (input_dim * 2, input_dim * 2),
        (input_dim * 2, input_dim // 2),
        (input_dim // 2, output_dim),
    ]
    params = []
    for fan_in, fan_out in dims:
        key, kw, kb = jax.random.split(key, 3)
        bound = 1.0 / jnp.sqrt(jnp.float32(fan_in))  # PyTorch default U(-1/sqrt(fan_in), +)
        w = jax.random.uniform(kw, (fan_in, fan_out), jnp.float32, -bound, bound)
        b = jax.random.uniform(kb, (1, fan_out), jnp.float32, -bound, bound)
        params.append((w, b))
    return params


def reference_forward(x, params):
    # LeakyReLU with negative_slope == 1.0 is the identity: plain affine chain.
    h = x
    for w, b in params:
        h = h @ w + b
    return h


if __name__ == "__main__":
    INPUT_DIM = 32
    OUTPUT_DIM = 4
    BATCH = 8

    key = jax.random.PRNGKey(0)
    key, kx = jax.random.split(key)
    x = jax.random.normal(kx, (BATCH, INPUT_DIM), jnp.float32)

    params = init_discriminator_params(key, INPUT_DIM, OUTPUT_DIM)

    out = discriminator_forward(x, params)
    out = jax.block_until_ready(out)

    ref = reference_forward(x, params)
    assert out.shape == (BATCH, OUTPUT_DIM)
    # Collapsed-chain vs per-layer reference differ only by fp32 re-association.
    assert jnp.allclose(out, ref, atol=1e-4, rtol=1e-4), "mismatch vs reference"

    print("KERNEL_OK")
</pallas_src>

<mosaic_0001>
module attributes {stable_mosaic.version = 11 : i64} {
  func.func @_affine_kernel(%arg0: i32, %arg1: memref<8x32xf32, #tpu.memory_space<vmem>>, %arg2: memref<32x128xf32, #tpu.memory_space<vmem>>, %arg3: memref<1x128xf32, #tpu.memory_space<vmem>>, %arg4: memref<8x128xf32, #tpu.memory_space<vmem>>) attributes {dimension_semantics = [#tpu.dimension_semantics<parallel>], iteration_bounds = array<i64: 1>, scalar_prefetch = 0 : i64, scratch_operands = 0 : i64, tpu.core_type = #tpu.core_type<tc>, window_params = [{transform_indices = @transform_0, window_bounds = array<i64: 8, 32>}, {pipeline_mode = #tpu.pipeline_mode<synchronous>, transform_indices = @transform_1, window_bounds = array<i64: 32, 128>}, {pipeline_mode = #tpu.pipeline_mode<synchronous>, transform_indices = @transform_2, window_bounds = array<i64: 1, 128>}, {transform_indices = @transform_3, window_bounds = array<i64: 8, 128>}]} {
    %c0 = arith.constant 0 : index
    %c0_0 = arith.constant 0 : index
    %0 = vector.load %arg1[%c0, %c0_0] : memref<8x32xf32, #tpu.memory_space<vmem>>, vector<8x32xf32>
    %c0_1 = arith.constant 0 : index
    %c0_2 = arith.constant 0 : index
    %1 = vector.load %arg2[%c0_1, %c0_2] : memref<32x128xf32, #tpu.memory_space<vmem>>, vector<32x128xf32>
    %cst = arith.constant dense<0.000000e+00> : vector<8x128xf32>
    %2 = tpu.matmul %0, %1, %cst {dimension_numbers = #tpu.dot_dimension_numbers<[1], [0], [0], [1], [0, 0, 1, 1], [], []>} : vector<8x32xf32>, vector<32x128xf32>, vector<8x128xf32> -> vector<8x128xf32>
    %c0_3 = arith.constant 0 : index
    %c0_4 = arith.constant 0 : index
    %3 = vector.load %arg3[%c0_3, %c0_4] : memref<1x128xf32, #tpu.memory_space<vmem>>, vector<1x128xf32>
    %4 = vector.broadcast %3 : vector<1x128xf32> to vector<8x128xf32>
    %5 = arith.addf %2, %4 : vector<8x128xf32>
    %c0_5 = arith.constant 0 : index
    %c0_6 = arith.constant 0 : index
    %6 = vector.load %arg4[%c0_5, %c0_6] : memref<8x128xf32, #tpu.memory_space<vmem>>, vector<8x128xf32>
    tpu.vector_store %arg4[%c0_5, %c0_6], %5 {strides = array<i32>} : memref<8x128xf32, #tpu.memory_space<vmem>>, vector<8x128xf32>,
    return
  }
  func.func @transform_0(%arg0: i32) -> (i32, i32) {
    %c0_i32 = arith.constant 0 : i32
    %c0_i32_0 = arith.constant 0 : i32
    return %arg0, %c0_i32 : i32, i32
  }
  func.func @transform_1(%arg0: i32) -> (i32, i32) {
    %c0_i32 = arith.constant 0 : i32
    %c0_i32_0 = arith.constant 0 : i32
    %c0_i32_1 = arith.constant 0 : i32
    return %c0_i32, %c0_i32_0 : i32, i32
  }
  func.func @transform_2(%arg0: i32) -> (i32, i32) {
    %c0_i32 = arith.constant 0 : i32
    %c0_i32_0 = arith.constant 0 : i32
    %c0_i32_1 = arith.constant 0 : i32
    return %c0_i32, %c0_i32_0 : i32, i32
  }
  func.func @transform_3(%arg0: i32) -> (i32, i32) {
    %c0_i32 = arith.constant 0 : i32
    %c0_i32_0 = arith.constant 0 : i32
    return %arg0, %c0_i32 : i32, i32
  }
}

</mosaic_0001>

<bundles_post_ra>
// kernel: discriminator_forward.1
= control target key start
LH: loop header
LB: loop body
LE: loop exit
PB: predicated region body
PF: predicated region fallthrough
CT: control target
= control target key end

     0   :  { %v125_v0 = vmov 0.0   ;;  %vm126_vm0 = vmmov 0   ;;  %vm26_vm1 = vcmask 261120   ;;  %s168_s1 = inlined_call_operand.vmem [shape: f32[32,128], index: 1, kind: input, shape index: {}]   ;;  %s169_s0 = inlined_call_operand.vmem [shape: f32[8,32], index: 0, kind: input, shape index: {}]   ;;  %s170_s2 = inlined_call_operand.vmem [shape: f32[1,128], index: 2, kind: input, shape index: {}]   ;;  %s171_s3 = inlined_call_operand.vmem [shape: f32[8,128], index: 3, kind: output, shape index: {}]  }
   0x1   :  { %112 = vmatprep.subr.mxu0 %v125_v0  ;;  %v18_v1 = vld [vmem:[%s168_s1 + $0x18] sm:$0xff]  ;;  %v17_v2 = vld [vmem:[%s168_s1 + $0x10] sm:$0xff]  ;;  %120 = vmatprep.mubr.msk.f32.mxu0 %vm126_vm0, %v125_v0  ;;  %v16_v3 = vld [vmem:[%s168_s1 + $0x8] sm:$0xff] }
   0x2   :  { %113 = vmatpush3.msra.mxu0 %v18_v1  ;;  %v15_v4 = vld [vmem:[%s168_s1] sm:$0xff] }
   0x3   :  { %114 = vmatprep.subr.mxu0 %v125_v0  ;;  %v14_v5 = vld [vmem:[%s169_s0] sm:$0xff] }
   0x4   :  { %115 = vmatpush3.msra.mxu0 %v17_v2  ;;  %v105_v6 = vld [vmem:[%s170_s2] ss:$0 sm:$0xff] }
   0x5   :  { %116 = vmatprep.subr.mxu0 %v125_v0 }
   0x6   :  { %117 = vmatpush3.msra.mxu0 %v16_v3 }
   0x7   :  { %118 = vmatprep.subr.mxu0 %v125_v0 }
   0x8   :  { %119 = vmatpush3.msra.mxu0 %v15_v4 }
   0x9   :  { %121 = vmatmul.mubr.msk.f32.vlgmr.msra.gmra.mxu0 %vm26_vm1, %v14_v5 }
  0xc9   :  { %v96_v7 = vpop.f32.mrf.mxu0 }
  0xca   :  { %v97_v8 = vadd.f32 %v105_v6, %v96_v7 }
  0xcb   :  { %v122_v9 = vpop.f32.mrf.mxu0 }
  0xcc   :  { %100 = vst [vmem:[%s171_s3] sm:$0xff] %v97_v8 }

</bundles_post_ra>
